<compile_context>
chip_gen: v5e
topology: v5e:2x2
jax: 0.10.0
libtpu: 0.0.40
codegen_flags: <defaults>
</compile_context>

<pallas_src>
import jax
import jax.numpy as jnp
from jax import lax
from jax.experimental import pallas as pl
from jax.experimental.pallas import tpu as pltpu


H1 = 128        # first hidden layer (already lane-dense)
H2 = 64         # second hidden layer (logical)
H2_PAD = 128    # second hidden layer padded to full lane width (zero pads keep math exact)
W3_ROWS = 8     # final-layer weight stored as an (8, H2_PAD) row block (row 0 = w3^T)
IN_PAD_TO = 8   # pad input features up to a multiple of 8 (done inside the kernel)


def _round_up(n, m):
    return ((n + m - 1) // m) * m


def discriminator_kernel(x_ref, w1_ref, b1_ref, w2_ref, b2_ref, w3t_ref, b3_ref,
                         o_ref, xpad_ref):
    # --- Zero-pad the feature axis in-kernel (no wrapper-side x materialization). ---
    if x_ref.shape[1] == xpad_ref.shape[1]:
        xpad_ref[...] = x_ref[...]
    else:
        xpad_ref[...] = jnp.zeros_like(xpad_ref)
        xpad_ref[:, : x_ref.shape[1]] = x_ref[...]
    x = xpad_ref[...]                                           # (TB, IN_PAD) f32

    # Layer 1: MXU matmul (f32) + bias + LeakyReLU(0.2) on the VPU.
    h1 = jnp.dot(x, w1_ref[...], preferred_element_type=jnp.float32) + b1_ref[...]
    h1 = jnp.maximum(h1, 0.2 * h1)
    # Dropout(0.3): identity in eval mode.

    # Layer 2 (hidden padded 64 -> 128 with zeros; padded lanes stay exactly 0).
    h2 = jnp.dot(h1, w2_ref[...], preferred_element_type=jnp.float32) + b2_ref[...]
    h2 = jnp.maximum(h2, 0.2 * h2)
    # Dropout(0.3): identity in eval mode.

    # Layer 3: produce the per-row scalar already packed on the LANE axis.  w3t is an
    # (8, H2_PAD) row block (row 0 = w3^T, rows 1..7 zero); contracting both operands'
    # last dims ("NT" matmul, as in the flash-attention kernels) gives
    # z8[m, b] = sum_k w3t[m, k] * h2[b, k], so row 0 is the whole batch tile along lanes.
    z8 = lax.dot_general(w3t_ref[...], h2, (((1,), (1,)), ((), ())),
                         preferred_element_type=jnp.float32)    # (W3_ROWS, TB)
    z = z8[0:1, :] + b3_ref[0]                                  # (1, TB)

    # Sigmoid over only the packed row: exp on the EUP, approximate reciprocal instead of a
    # full divide.
    o_ref[...] = pl.reciprocal(1.0 + jnp.exp(-z), approx=True)


def _choose_tiling(batch, tile_b):
    """Pick (tile_rows, n_steps).  Multi-step tiles are multiples of 128 (lane-aligned
    packed-output blocks); aim for >=2 roughly balanced steps so v7x can shard the batch
    axis across both TensorCores."""
    lanes = pl.cdiv(batch, 128)
    if lanes <= 1:
        return batch, 1                      # tiny batch: single full-array block
    tb = max(128, min(tile_b, 128 * ((lanes + 1) // 2)))
    return tb, pl.cdiv(batch, tb)


def prepare_params(params):
    """One-time padding / layout prep of the weights (hoisted out of the forward pass)."""
    w1, b1 = params["w1"], params["b1"]          # (in_dim, 128), (1, 128)
    w2, b2 = params["w2"], params["b2"]          # (128, 64),     (1, 64)
    w3, b3 = params["w3"], params["b3"]          # (64, 1),       (1, 1)
    in_dim = w1.shape[0]
    in_pad = _round_up(in_dim, IN_PAD_TO)
    w1p = jnp.zeros((in_pad, H1), jnp.float32).at[:in_dim, :].set(w1.astype(jnp.float32))
    b1p = b1.reshape(1, H1).astype(jnp.float32)
    w2p = jnp.zeros((H1, H2_PAD), jnp.float32).at[:, :H2].set(w2.astype(jnp.float32))
    b2p = jnp.zeros((1, H2_PAD), jnp.float32).at[:, :H2].set(b2.reshape(1, H2))
    w3t = jnp.zeros((W3_ROWS, H2_PAD), jnp.float32).at[0, :H2].set(w3.reshape(H2))
    b3s = b3.reshape(1).astype(jnp.float32)      # scalar bias -> SMEM
    return {"w1": w1p, "b1": b1p, "w2": w2p, "b2": b2p, "w3t": w3t, "b3": b3s,
            "in_dim": in_dim, "in_pad": in_pad}


def discriminator_forward(x, prepared, *, tile_b=2048):
    """x: (B, input_dim) float32.  Returns (B, 1) float32 = sigmoid(MLP(x))."""
    assert tile_b % 128 == 0
    B, in_dim = x.shape
    assert in_dim == prepared["in_dim"]
    in_pad = prepared["in_pad"]

    tb, n_steps = _choose_tiling(B, tile_b)
    out_cols = n_steps * tb                      # lane-packed output row length

    flops = 2 * out_cols * (in_pad * H1 + H1 * H2_PAD + W3_ROWS * H2_PAD)
    bytes_accessed = (
        B * in_dim * 4
        + 4 * (prepared["w1"].size + prepared["b1"].size + prepared["w2"].size
               + prepared["b2"].size + prepared["w3t"].size + prepared["b3"].size)
        + out_cols * 4
    )

    const = lambda i: (0, 0)
    out_row = pl.pallas_call(
        discriminator_kernel,
        out_shape=jax.ShapeDtypeStruct((1, out_cols), jnp.float32),
        grid=(n_steps,),
        in_specs=[
            pl.BlockSpec((tb, in_dim), lambda i: (i, 0)),       # x: pipelined over batch
            pl.BlockSpec((in_pad, H1), const),                  # weights: VMEM-resident
            pl.BlockSpec((1, H1), const),
            pl.BlockSpec((H1, H2_PAD), const),
            pl.BlockSpec((1, H2_PAD), const),
            pl.BlockSpec((W3_ROWS, H2_PAD), const),
            pl.BlockSpec(memory_space=pltpu.MemorySpace.SMEM),  # b3 scalar
        ],
        out_specs=pl.BlockSpec((1, tb), lambda i: (0, i)),      # lane-packed output
        scratch_shapes=[pltpu.VMEM((tb, in_pad), jnp.float32)],
        compiler_params=pltpu.CompilerParams(
            dimension_semantics=("parallel",),
        ),
        cost_estimate=pl.CostEstimate(
            flops=flops, transcendentals=out_cols, bytes_accessed=bytes_accessed),
    )(x.astype(jnp.float32), prepared["w1"], prepared["b1"], prepared["w2"],
      prepared["b2"], prepared["w3t"], prepared["b3"])

    return out_row[0, :B].reshape(B, 1)


def init_params(key, input_dim):
    """PyTorch-style uniform init; weights stored pre-transposed to (in, out)."""
    ks = jax.random.split(key, 6)

    def linear(kw, kb, fan_in, fan_out):
        bound = 1.0 / jnp.sqrt(fan_in)
        w = jax.random.uniform(kw, (fan_in, fan_out), jnp.float32, -bound, bound)
        b = jax.random.uniform(kb, (1, fan_out), jnp.float32, -bound, bound)
        return w, b

    w1, b1 = linear(ks[0], ks[1], input_dim, 128)
    w2, b2 = linear(ks[2], ks[3], 128, 64)
    w3, b3 = linear(ks[4], ks[5], 64, 1)
    return {"w1": w1, "b1": b1, "w2": w2, "b2": b2, "w3": w3, "b3": b3}


def reference_forward(x, params):
    """Pure-JAX f32 reference (eval-mode dropout)."""
    h1 = x @ params["w1"] + params["b1"]
    h1 = jnp.where(h1 > 0, h1, 0.2 * h1)
    h2 = h1 @ params["w2"] + params["b2"]
    h2 = jnp.where(h2 > 0, h2, 0.2 * h2)
    z = h2 @ params["w3"] + params["b3"]
    return 1.0 / (1.0 + jnp.exp(-z))


if __name__ == "__main__":
    key = jax.random.PRNGKey(0)
    k_x, k_p, k_x2 = jax.random.split(key, 3)

    # PCA(n_components=7) in the original script => input_dim = 7.
    input_dim = 7
    params = init_params(k_p, input_dim)
    prepared = prepare_params(params)

    # Small batch: single full-array tile.
    x_small = jax.random.normal(k_x, (8, input_dim), dtype=jnp.float32)
    out_small = jax.block_until_ready(discriminator_forward(x_small, prepared))
    ref_small = reference_forward(x_small, params)
    assert out_small.shape == (8, 1), f"bad output shape {out_small.shape}"
    assert jnp.allclose(out_small, ref_small, atol=2e-3, rtol=2e-3), "small-batch mismatch"

    # Moderate batch: exercises the 2-step grid, ragged last tile, lane-packed output path.
    x_big = jax.random.normal(k_x2, (300, input_dim), dtype=jnp.float32)
    out_big = jax.block_until_ready(discriminator_forward(x_big, prepared))
    ref_big = reference_forward(x_big, params)
    assert out_big.shape == (300, 1), f"bad output shape {out_big.shape}"
    assert jnp.allclose(out_big, ref_big, atol=2e-3, rtol=2e-3), "multi-tile mismatch"

    print("KERNEL_OK")
</pallas_src>

<mosaic_0001>
module attributes {stable_mosaic.version = 11 : i64} {
  func.func @discriminator_kernel(%arg0: i32, %arg1: memref<8x7xf32, #tpu.memory_space<vmem>>, %arg2: memref<8x128xf32, #tpu.memory_space<vmem>>, %arg3: memref<1x128xf32, #tpu.memory_space<vmem>>, %arg4: memref<128x128xf32, #tpu.memory_space<vmem>>, %arg5: memref<1x128xf32, #tpu.memory_space<vmem>>, %arg6: memref<8x128xf32, #tpu.memory_space<vmem>>, %arg7: memref<1xf32, #tpu.memory_space<smem>>, %arg8: memref<1x8xf32, #tpu.memory_space<vmem>>, %arg9: memref<8x8xf32, #tpu.memory_space<vmem>>) attributes {dimension_semantics = [#tpu.dimension_semantics<parallel>], iteration_bounds = array<i64: 1>, scalar_prefetch = 0 : i64, scratch_operands = 1 : i64, tpu.core_type = #tpu.core_type<tc>, window_params = [{transform_indices = @transform_0, window_bounds = array<i64: 8, 7>}, {pipeline_mode = #tpu.pipeline_mode<synchronous>, transform_indices = @transform_1, window_bounds = array<i64: 8, 128>}, {pipeline_mode = #tpu.pipeline_mode<synchronous>, transform_indices = @transform_2, window_bounds = array<i64: 1, 128>}, {pipeline_mode = #tpu.pipeline_mode<synchronous>, transform_indices = @transform_3, window_bounds = array<i64: 128, 128>}, {pipeline_mode = #tpu.pipeline_mode<synchronous>, transform_indices = @transform_4, window_bounds = array<i64: 1, 128>}, {pipeline_mode = #tpu.pipeline_mode<synchronous>, transform_indices = @transform_5, window_bounds = array<i64: 8, 128>}, {transform_indices = @transform_6, window_bounds = array<i64: 1>}, {transform_indices = @transform_7, window_bounds = array<i64: 1, 8>}]} {
    %cst = arith.constant 0.000000e+00 : f32
    %0 = vector.broadcast %cst : f32 to vector<8x8xf32>
    %c0 = arith.constant 0 : index
    %c0_0 = arith.constant 0 : index
    %1 = vector.load %arg9[%c0, %c0_0] : memref<8x8xf32, #tpu.memory_space<vmem>>, vector<8x8xf32>
    tpu.vector_store %arg9[%c0, %c0_0], %0 {strides = array<i32>} : memref<8x8xf32, #tpu.memory_space<vmem>>, vector<8x8xf32>,
    %c0_1 = arith.constant 0 : index
    %c0_2 = arith.constant 0 : index
    %2 = vector.load %arg1[%c0_1, %c0_2] : memref<8x7xf32, #tpu.memory_space<vmem>>, vector<8x7xf32>
    %c0_3 = arith.constant 0 : index
    %c0_4 = arith.constant 0 : index
    %3 = vector.load %arg9[%c0_3, %c0_4] : memref<8x8xf32, #tpu.memory_space<vmem>>, vector<8x7xf32>
    tpu.vector_store %arg9[%c0_3, %c0_4], %2 {strides = array<i32>} : memref<8x8xf32, #tpu.memory_space<vmem>>, vector<8x7xf32>,
    %c0_5 = arith.constant 0 : index
    %c0_6 = arith.constant 0 : index
    %4 = vector.load %arg9[%c0_5, %c0_6] : memref<8x8xf32, #tpu.memory_space<vmem>>, vector<8x8xf32>
    %c0_7 = arith.constant 0 : index
    %c0_8 = arith.constant 0 : index
    %5 = vector.load %arg2[%c0_7, %c0_8] : memref<8x128xf32, #tpu.memory_space<vmem>>, vector<8x128xf32>
    %cst_9 = arith.constant dense<0.000000e+00> : vector<8x128xf32>
    %6 = tpu.matmul %4, %5, %cst_9 {dimension_numbers = #tpu.dot_dimension_numbers<[1], [0], [0], [1], [0, 0, 1, 1], [], []>} : vector<8x8xf32>, vector<8x128xf32>, vector<8x128xf32> -> vector<8x128xf32>
    %c0_10 = arith.constant 0 : index
    %c0_11 = arith.constant 0 : index
    %7 = vector.load %arg3[%c0_10, %c0_11] : memref<1x128xf32, #tpu.memory_space<vmem>>, vector<1x128xf32>
    %8 = vector.broadcast %7 : vector<1x128xf32> to vector<8x128xf32>
    %9 = arith.addf %6, %8 : vector<8x128xf32>
    %cst_12 = arith.constant 2.000000e-01 : f32
    %10 = vector.broadcast %cst_12 : f32 to vector<8x128xf32>
    %11 = arith.mulf %10, %9 : vector<8x128xf32>
    %12 = arith.maximumf %9, %11 : vector<8x128xf32>
    %c0_13 = arith.constant 0 : index
    %c0_14 = arith.constant 0 : index
    %13 = vector.load %arg4[%c0_13, %c0_14] : memref<128x128xf32, #tpu.memory_space<vmem>>, vector<128x128xf32>
    %cst_15 = arith.constant dense<0.000000e+00> : vector<8x128xf32>
    %14 = tpu.matmul %12, %13, %cst_15 {dimension_numbers = #tpu.dot_dimension_numbers<[1], [0], [0], [1], [0, 0, 1, 1], [], []>} : vector<8x128xf32>, vector<128x128xf32>, vector<8x128xf32> -> vector<8x128xf32>
    %c0_16 = arith.constant 0 : index
    %c0_17 = arith.constant 0 : index
    %15 = vector.load %arg5[%c0_16, %c0_17] : memref<1x128xf32, #tpu.memory_space<vmem>>, vector<1x128xf32>
    %16 = vector.broadcast %15 : vector<1x128xf32> to vector<8x128xf32>
    %17 = arith.addf %14, %16 : vector<8x128xf32>
    %cst_18 = arith.constant 2.000000e-01 : f32
    %18 = vector.broadcast %cst_18 : f32 to vector<8x128xf32>
    %19 = arith.mulf %18, %17 : vector<8x128xf32>
    %20 = arith.maximumf %17, %19 : vector<8x128xf32>
    %c0_19 = arith.constant 0 : index
    %c0_20 = arith.constant 0 : index
    %21 = vector.load %arg6[%c0_19, %c0_20] : memref<8x128xf32, #tpu.memory_space<vmem>>, vector<8x128xf32>
    %cst_21 = arith.constant dense<0.000000e+00> : vector<8x8xf32>
    %22 = tpu.matmul %21, %20, %cst_21 {dimension_numbers = #tpu.dot_dimension_numbers<[1], [1], [0], [0], [0, 0, 1, 0], [], []>} : vector<8x128xf32>, vector<8x128xf32>, vector<8x8xf32> -> vector<8x8xf32>
    %23 = vector.extract_strided_slice %22 {offsets = [0, 0], sizes = [1, 8], strides = [1, 1]} : vector<8x8xf32> to vector<1x8xf32>
    %c0_22 = arith.constant 0 : index
    %24 = memref.load %arg7[%c0_22] : memref<1xf32, #tpu.memory_space<smem>>
    %25 = vector.broadcast %24 : f32 to vector<1x8xf32>
    %26 = arith.addf %23, %25 : vector<1x8xf32>
    %cst_23 = arith.constant 0.000000e+00 : f32
    %27 = vector.broadcast %cst_23 : f32 to vector<1x8xf32>
    %28 = arith.subf %27, %26 : vector<1x8xf32>
    %29 = math.exp %28 : vector<1x8xf32>
    %cst_24 = arith.constant 1.000000e+00 : f32
    %30 = vector.broadcast %cst_24 : f32 to vector<1x8xf32>
    %31 = arith.addf %30, %29 : vector<1x8xf32>
    %32 = tpu.reciprocal %31 {approx = true} : vector<1x8xf32> -> vector<1x8xf32>
    %c0_25 = arith.constant 0 : index
    %c0_26 = arith.constant 0 : index
    %33 = vector.load %arg8[%c0_25, %c0_26] : memref<1x8xf32, #tpu.memory_space<vmem>>, vector<1x8xf32>
    tpu.vector_store %arg8[%c0_25, %c0_26], %32 {strides = array<i32>} : memref<1x8xf32, #tpu.memory_space<vmem>>, vector<1x8xf32>,
    return
  }
  func.func @transform_0(%arg0: i32) -> (i32, i32) {
    %c0_i32 = arith.constant 0 : i32
    %c0_i32_0 = arith.constant 0 : i32
    return %arg0, %c0_i32 : i32, i32
  }
  func.func @transform_1(%arg0: i32) -> (i32, i32) {
    %c0_i32 = arith.constant 0 : i32
    %c0_i32_0 = arith.constant 0 : i32
    %c0_i32_1 = arith.constant 0 : i32
    return %c0_i32, %c0_i32_0 : i32, i32
  }
  func.func @transform_2(%arg0: i32) -> (i32, i32) {
    %c0_i32 = arith.constant 0 : i32
    %c0_i32_0 = arith.constant 0 : i32
    %c0_i32_1 = arith.constant 0 : i32
    return %c0_i32, %c0_i32_0 : i32, i32
  }
  func.func @transform_3(%arg0: i32) -> (i32, i32) {
    %c0_i32 = arith.constant 0 : i32
    %c0_i32_0 = arith.constant 0 : i32
    %c0_i32_1 = arith.constant 0 : i32
    return %c0_i32, %c0_i32_0 : i32, i32
  }
  func.func @transform_4(%arg0: i32) -> (i32, i32) {
    %c0_i32 = arith.constant 0 : i32
    %c0_i32_0 = arith.constant 0 : i32
    %c0_i32_1 = arith.constant 0 : i32
    return %c0_i32, %c0_i32_0 : i32, i32
  }
  func.func @transform_5(%arg0: i32) -> (i32, i32) {
    %c0_i32 = arith.constant 0 : i32
    %c0_i32_0 = arith.constant 0 : i32
    %c0_i32_1 = arith.constant 0 : i32
    return %c0_i32, %c0_i32_0 : i32, i32
  }
  func.func @transform_6(%arg0: i32) -> i32 {
    %c0_i32 = arith.constant 0 : i32
    %c0_i32_0 = arith.constant 0 : i32
    return %c0_i32 : i32
  }
  func.func @transform_7(%arg0: i32) -> (i32, i32) {
    %c0_i32 = arith.constant 0 : i32
    %c0_i32_0 = arith.constant 0 : i32
    return %c0_i32, %arg0 : i32, i32
  }
}

</mosaic_0001>

<bundles_post_ra>
// kernel: tpu_custom_call.1
= control target key start
LH: loop header
LB: loop body
LE: loop exit
PB: predicated region body
PF: predicated region fallthrough
CT: control target
= control target key end

     0   :  { %13 = vsyncpa [#allocation5], 0  ;;  %s430_s0 = inlined_call_operand.hbm [shape: f32[8,7], index: 0, kind: input, shape index: {}]   ;;  %s431_s1 = inlined_call_operand.hbm [shape: f32[8,128], index: 1, kind: input, shape index: {}]   ;;  %s432_s2 = inlined_call_operand.vmem [shape: f32[1,128], index: 2, kind: input, shape index: {}]   ;;  %s433_s3 = inlined_call_operand.hbm [shape: f32[128,128], index: 3, kind: input, shape index: {}]   ;;  %s434_s4 = inlined_call_operand.vmem [shape: f32[1,128], index: 4, kind: input, shape index: {}]   ;;  %s435_s5 = inlined_call_operand.hbm [shape: f32[8,128], index: 5, kind: input, shape index: {}]   ;;  %s436_s6 = inlined_call_operand.<no memory space> [shape: f32[1], index: 6, kind: input, shape index: {}]   ;;  %s437_s7 = inlined_call_operand.hbm [shape: f32[1,8], index: 7, kind: output, shape index: {}]  }
   0x1   :  { %14 = vsyncpa [#allocation8], 0 }
   0x2   :  { %15 = vsyncpa [#allocation11], 0  ;;  %s33_s26 = sshll.u32 %s431_s1, 4  ;;  %s34_s26 = int_to_ptr.hbm [resolvable:$true] %s33_s26 }
   0x3   :  { %16 = vsyncpa [#allocation6], 0  ;;  %s356_s27 = smov [#allocation7]   ;;  %s22_s8 = sshll.u32 %s430_s0, 4  ;;  %s23_s8 = int_to_ptr.hbm [resolvable:$true] %s22_s8 }
   0x4   :  { %s35_s28 = sshll.u32 %s356_s27, 4  ;;  %s357_s9 = smov [#allocation4]   ;;  %s36_s28 = int_to_ptr.vmem [resolvable:$true] %s35_s28 }
   0x5   :  { %38 = dma.hbm_to_vmem [thread:$0]  %s34_s26, 128, %s36_s28, [#allocation8]  }
   0x6   :  { %s24_s10 = sshll.u32 %s357_s9, 4  ;;  %s45_s13 = sshll.u32 %s433_s3, 4  ;;  %s25_s10 = int_to_ptr.vmem [resolvable:$true] %s24_s10  ;;  %s46_s13 = int_to_ptr.hbm [resolvable:$true] %s45_s13 }
   0x7   :  { %27 = dma.hbm_to_vmem [thread:$0]  %s23_s8, 128, %s25_s10, [#allocation5]  }
   0x8   :  { %s358_s1 = smov [#allocation9]   ;;  %s61_s17 = sshll.u32 %s435_s5, 4  ;;  %s62_s17 = int_to_ptr.hbm [resolvable:$true] %s61_s17 }
   0x9   :  { %s47_s14 = sshll.u32 %s358_s1, 4  ;;  %s359_s18 = smov 128   ;;  %s48_s14 = int_to_ptr.vmem [resolvable:$true] %s47_s14 }
   0xa   :  { %s360_s0 = smov 8   ;;  %s361_s19 = smov [#allocation10]  }
   0xb   :  { %53 = dma.hbm_to_vmem [thread:$0]  %s46_s13, 2048, %s48_s14, [#allocation8], %s359_s18, %s359_s18, %s360_s0  }
   0xc   :  { %s63_s20 = sshll.u32 %s361_s19, 4  ;;  %s64_s20 = int_to_ptr.vmem [resolvable:$true] %s63_s20 }
   0xd   :  { %66 = dma.hbm_to_vmem [thread:$0]  %s62_s17, 128, %s64_s20, [#allocation11]  }
   0xe   :  { %348 = dma.done.wait [#allocation5], 128  }
   0xf   :  { %349 = vsyncadd [#allocation5], 4294967168 }
  0x10   :  { %350 = dma.done.wait [#allocation8], 2176  }
  0x11   :  { %351 = vsyncadd [#allocation8], 4294965120 }
  0x12   :  { %352 = dma.done.wait [#allocation11], 128  }
  0x13   :  { %353 = vsyncadd [#allocation11], 4294967168  ;;  %vm85_vm0 = vcmask 64512   ;;  %v362_v0 = vmov 0.0   ;;  %vm88_vm1 = vcmask 56320   ;;  %v91_v1 = vld [vmem:[#allocation7] sm:$0xff]  ;;  %v185_v31 = vstv %s436_s6 }
  0x14   :  { %86 = vst.msk [vmem:[#allocation2] sm:$0xff] %vm85_vm0, %v362_v0  ;;  %v87_v2 = vld [vmem:[#allocation4] sm:$0xff]  ;;  %v136_v3 = vld [vmem:[#allocation9 + $0x78] sm:$0xff]  ;;  %114 = vmatpush.msra.mxu0 %v91_v1  ;;  %v134_v5 = vld [vmem:[#allocation9 + $0x68] sm:$0xff]  ;;  %s201_s27 = sshll.u32 %s437_s7, 4  ;;  %vm192_vm2 = vcmask 57344   ;;  %s202_s27 = int_to_ptr.hbm [resolvable:$true] %s201_s27 }
  0x15   :  { %89 = vst.msk [vmem:[#allocation2] sm:$0xff] %vm88_vm1, %v87_v2  ;;  %141 = vmatpush.msra.mxu1 %v136_v3  ;;  %v135_v4 = vld [vmem:[#allocation9 + $0x70] sm:$0xff]  ;;  %v133_v6 = vld [vmem:[#allocation9 + $0x60] sm:$0xff]  ;;  %v132_v7 = vld [vmem:[#allocation9 + $0x58] sm:$0xff] }
  0x16   :  { %v131_v9 = vld [vmem:[#allocation9 + $0x50] sm:$0xff]  ;;  %v130_v10 = vld [vmem:[#allocation9 + $0x48] sm:$0xff]  ;;  %v129_v11 = vld [vmem:[#allocation9 + $0x40] sm:$0xff] }
  0x17   :  { %142 = vmatpush.msra.mxu1 %v135_v4  ;;  %v128_v12 = vld [vmem:[#allocation9 + $0x38] sm:$0xff]  ;;  %v127_v13 = vld [vmem:[#allocation9 + $0x30] sm:$0xff]  ;;  %v126_v14 = vld [vmem:[#allocation9 + $0x28] sm:$0xff] }
  0x18   :  { %v125_v15 = vld [vmem:[#allocation9 + $0x20] sm:$0xff]  ;;  %v124_v16 = vld [vmem:[#allocation9 + $0x18] sm:$0xff]  ;;  %v123_v17 = vld [vmem:[#allocation9 + $0x10] sm:$0xff] }
  0x19   :  { %143 = vmatpush.msra.mxu1 %v134_v5  ;;  %v122_v18 = vld [vmem:[#allocation9 + $0x8] sm:$0xff]  ;;  %v121_v19 = vld [vmem:[#allocation9] sm:$0xff] }
  0x1a   :  { %v222_v20 = vld [vmem:[%s432_s2] ss:$0 sm:$0xff]  ;;  %v163_v30 = vld [vmem:[#allocation10] sm:$0xff]  ;;  %s363_s2 = smov [#allocation12]  }
  0x1b   :  { %144 = vmatpush.msra.mxu1 %v133_v6  ;;  %v223_v25 = vld [vmem:[%s434_s4] ss:$0 sm:$0xff]  ;;  %s199_s4 = sshll.u32 %s363_s2, 4  ;;  %s200_s4 = int_to_ptr.vmem [resolvable:$true] %s199_s4 }
  0x1c   :  { %v90_v8 = vld [vmem:[#allocation2] sm:$0xff] }
  0x1d   :  { %213 = vmatmul.msk.f32.vlgmr.msra.gmra.mxu0 %vm85_vm0, %v90_v8  ;;  %145 = vmatpush.msra.mxu1 %v132_v7 }
  0x1f   :  { %146 = vmatpush.msra.mxu1 %v131_v9 }
  0x21   :  { %147 = vmatpush.msra.mxu1 %v130_v10 }
  0x23   :  { %148 = vmatpush.msra.mxu1 %v129_v11 }
  0x25   :  { %149 = vmatpush.msra.mxu1 %v128_v12 }
  0x27   :  { %150 = vmatpush.msra.mxu1 %v127_v13 }
  0x29   :  { %151 = vmatpush.msra.mxu1 %v126_v14 }
  0x2b   :  { %152 = vmatpush.msra.mxu1 %v125_v15 }
  0x2d   :  { %153 = vmatpush.msra.mxu1 %v124_v16 }
  0x2f   :  { %154 = vmatpush.msra.mxu1 %v123_v17 }
  0x31   :  { %155 = vmatpush.msra.mxu1 %v122_v18 }
  0x33   :  { %156 = vmatpush.msra.mxu1 %v121_v19 }
  0x9a   :  { %v116_v21 = vpop.f32.mrf.mxu0 }
  0x9b   :  { %v117_v22 = vadd.f32 %v222_v20, %v116_v21 }
  0x9d   :  { %v119_v23 = vmul.f32 0.2, %v117_v22 }
  0x9f   :  { %v120_v24 = vmax.f32 %v117_v22, %v119_v23 }
  0xa1   :  { %157 = vmatmul.f32.vlgmr.msra.gmra.mxu1 %v120_v24 }
 0x11e   :  { %v158_v26 = vpop.f32.mrf.mxu1 }
 0x11f   :  { %v159_v27 = vadd.f32 %v223_v25, %v158_v26 }
 0x121   :  { %v161_v28 = vmul.f32 0.2, %v159_v27 }
 0x123   :  { %v162_v29 = vmax.f32 %v159_v27, %v161_v28 }
 0x125   :  { %179 = vmatpush.xpose.msra.mxu2 %v162_v29 }
 0x128   :  { %180 = vmatmul.f32.vlgmr.msra.gmra.mxu2 %v163_v30 }
 0x1ab   :  { %v181_v32 = vpop.f32.mrf.mxu2 }
 0x1ac   :  { %v186_v33 = vadd.f32 %v185_v31, %v181_v32 }
 0x1ae   :  { %v187_v34 = vsub.f32 0.0, %v186_v33 }
 0x1b0   :  { %v188_v35 = vmul.f32 1.442695, %v187_v34 }
 0x1b2   :  { %224 = vpow2.f32 %v188_v35 }
 0x1b8   :  { %v225_v36 = vpop.eup %224 }
 0x1b9   :  { %v190_v37 = vadd.f32 1.0, %v225_v36 }
 0x1bb   :  { %226 = vrcp.f32 %v190_v37 }
 0x1c1   :  { %v227_v38 = vpop.eup %226 }
 0x1c2   :  { %193 = vst.msk [vmem:[#allocation12] sm:$0x1] %vm192_vm2, %v227_v38 }
 0x1c3   :  { %204 = dma.vmem_to_hbm [thread:$0]  %s200_s4, 16, %s202_s27, [#allocation6]  }
 0x1c4   :  { %354 = dma.done.wait [#allocation6], 16  }
 0x1c5   :  { %355 = vsyncadd [#allocation6], 4294967280 }
 0x1c6   :  { %209 = vsyncpa [#allocation5], 1 }
 0x1c7   :  { %210 = vsyncpa [#allocation8], 1 }
 0x1c8   :  { %211 = vsyncpa [#allocation11], 1 }
 0x1c9   :  { %212 = vsyncpa [#allocation6], 1 }

</bundles_post_ra>
